<compile_context>
chip_gen: v5e
topology: v5e:2x2
jax: 0.10.0
libtpu: 0.0.40
codegen_flags: <defaults>
</compile_context>

<pallas_src>
import jax
import jax.numpy as jnp
from jax.experimental import pallas as pl
from jax.experimental.pallas import tpu as pltpu


def _cond_shift_kernel(x_ref, s_ref, y_ref):
    # s_ref is (tile_m, 1): one shift per row, lane-broadcast by the VPU add.
    # Promotion (e.g. bf16 + f32) happens in-register; store in the output dtype.
    y_ref[...] = (x_ref[...] + s_ref[...]).astype(y_ref.dtype)


def _choose_tile_m(M, D, x_itemsize, out_itemsize):
    """Pick a row-tile from a VMEM byte budget, respecting sublane packing."""
    min_itemsize = min(x_itemsize, out_itemsize)
    sublane = 32 // min_itemsize if min_itemsize in (1, 2) else 8  # 8 f32, 16 bf16, 32 int8
    row_bytes = D * max(x_itemsize, out_itemsize)
    # ~2 MiB blocks for f32, ~4 MiB for <=2-byte dtypes (traffic halves -> bump target).
    target_block_bytes = (4 << 20) if max(x_itemsize, out_itemsize) <= 2 else (2 << 20)
    rows = max(sublane, (target_block_bytes // row_bytes) // sublane * sublane)

    # Prefer >=8 grid steps (pipelining + v7x dual-TC sharding) as long as each
    # block stays >= ~512 KiB; always force >=2 steps when the array allows it.
    for steps, min_block in ((8, 512 << 10), (2, 0)):
        cap = (M // steps) // sublane * sublane
        if cap >= sublane and cap * row_bytes >= min_block:
            rows = min(rows, cap)
            break

    return min(rows, M)


def conditional_shift_forward(x, shift, *, donate_x=False):
    """ConditionalShift.forward: y = x + shift (broadcast over spatial dims), log_det = 0.

    x:     [B, C, H, W]
    shift: [B, C]  (output of the conditional_shift sub-module, broadcast over H, W)
    """
    B, C, H, W = x.shape
    assert shift.shape == (B, C)

    out_dtype = jnp.result_type(x.dtype, shift.dtype)   # PyTorch-style promotion
    M, D = B * C, H * W                                  # rows = broadcast groups, lanes = spatial
    # NOTE: keep the output last dim lane-dense (multiple of 128) whenever H*W
    # allows it; masked partial stores were the biggest measured lever.
    x2 = x.reshape(M, D)
    s2 = shift.reshape(M, 1)

    x_itemsize = jnp.dtype(x.dtype).itemsize
    s_itemsize = jnp.dtype(shift.dtype).itemsize
    out_itemsize = jnp.dtype(out_dtype).itemsize

    tile_m = _choose_tile_m(M, D, x_itemsize, out_itemsize)
    grid = (pl.cdiv(M, tile_m),)                         # ragged last block handled by Pallas

    # Explicit scoped-VMEM budget: double-buffered x-in + y-out + shift column,
    # plus headroom; independent of the per-generation scoped defaults.
    x_block = tile_m * D * x_itemsize
    y_block = tile_m * D * out_itemsize
    s_block = tile_m * s_itemsize
    vmem_limit = min(48 << 20, 2 * (x_block + y_block + s_block) + (4 << 20))

    bytes_accessed = (x2.size * x_itemsize            # read x
                      + s2.size * s_itemsize          # read shift
                      + M * D * out_itemsize)         # write y

    alias = {0: 0} if (donate_x and x.dtype == out_dtype) else {}

    y2 = pl.pallas_call(
        _cond_shift_kernel,
        out_shape=jax.ShapeDtypeStruct((M, D), out_dtype),
        grid_spec=pltpu.PrefetchScalarGridSpec(
            num_scalar_prefetch=0,
            grid=grid,
            in_specs=[
                pl.BlockSpec((tile_m, D), lambda i: (i, 0)),
                pl.BlockSpec((tile_m, 1), lambda i: (i, 0)),
            ],
            out_specs=pl.BlockSpec((tile_m, D), lambda i: (i, 0)),
        ),
        compiler_params=pltpu.CompilerParams(
            dimension_semantics=("parallel",),
            vmem_limit_bytes=int(vmem_limit),
        ),
        cost_estimate=pl.CostEstimate(
            flops=M * D, transcendentals=0, bytes_accessed=int(bytes_accessed)),
        input_output_aliases=alias,
    )(x2, s2)

    y = y2.reshape(B, C, H, W)
    # The reference module literally returns (x + shift, 0): a constant scalar
    # zero log-det (volume preserving).
    # TODO(synk): some flow APIs expect a per-sample [B] log-det of zeros;
    # broadcast here if the surrounding framework needs that convention.
    log_det = jnp.zeros((), dtype=out_dtype)
    return y, log_det


if __name__ == "__main__":
    key = jax.random.PRNGKey(0)
    kx, kc, kw, kb = jax.random.split(key, 4)
    B, C, H, W, K = 2, 4, 16, 16, 8

    x = jax.random.normal(kx, (B, C, H, W), dtype=jnp.float32)
    cond = jax.random.normal(kc, (B, K), dtype=jnp.float32)

    # TODO(synk): `conditional_shift` is an arbitrary nn.Module in the spec; it is
    # modeled here as a fixed linear layer on cond, evaluated in plain JAX.
    w = jax.random.normal(kw, (K, C), dtype=jnp.float32) * 0.1
    b = jax.random.normal(kb, (C,), dtype=jnp.float32) * 0.1
    shift = cond @ w + b                                   # [B, C]

    y, log_det = conditional_shift_forward(x, shift)
    jax.block_until_ready((y, log_det))

    # Reference: forward returns (x + shift, 0).
    y_ref = x + shift[:, :, None, None]
    assert y.shape == x.shape
    assert jnp.allclose(y, y_ref, atol=1e-6, rtol=1e-6)
    assert float(log_det) == 0.0

    print("KERNEL_OK")
</pallas_src>

<mosaic_0001>
module attributes {stable_mosaic.version = 11 : i64} {
  func.func @_cond_shift_kernel(%arg0: i32, %arg1: memref<8x256xf32, #tpu.memory_space<vmem>>, %arg2: memref<8x1xf32, #tpu.memory_space<vmem>>, %arg3: memref<8x256xf32, #tpu.memory_space<vmem>>) attributes {dimension_semantics = [#tpu.dimension_semantics<parallel>], iteration_bounds = array<i64: 1>, scalar_prefetch = 0 : i64, scratch_operands = 0 : i64, tpu.core_type = #tpu.core_type<tc>, window_params = [{transform_indices = @transform_0, window_bounds = array<i64: 8, 256>}, {transform_indices = @transform_1, window_bounds = array<i64: 8, 1>}, {transform_indices = @transform_2, window_bounds = array<i64: 8, 256>}]} {
    %c0 = arith.constant 0 : index
    %c0_0 = arith.constant 0 : index
    %0 = vector.load %arg1[%c0, %c0_0] : memref<8x256xf32, #tpu.memory_space<vmem>>, vector<8x256xf32>
    %c0_1 = arith.constant 0 : index
    %c0_2 = arith.constant 0 : index
    %1 = vector.load %arg2[%c0_1, %c0_2] : memref<8x1xf32, #tpu.memory_space<vmem>>, vector<8x1xf32>
    %2 = vector.broadcast %1 : vector<8x1xf32> to vector<8x256xf32>
    %3 = arith.addf %0, %2 : vector<8x256xf32>
    %c0_3 = arith.constant 0 : index
    %c0_4 = arith.constant 0 : index
    %4 = vector.load %arg3[%c0_3, %c0_4] : memref<8x256xf32, #tpu.memory_space<vmem>>, vector<8x256xf32>
    tpu.vector_store %arg3[%c0_3, %c0_4], %3 {strides = array<i32>} : memref<8x256xf32, #tpu.memory_space<vmem>>, vector<8x256xf32>,
    return
  }
  func.func @transform_0(%arg0: i32) -> (i32, i32) {
    %c0_i32 = arith.constant 0 : i32
    %c0_i32_0 = arith.constant 0 : i32
    return %arg0, %c0_i32 : i32, i32
  }
  func.func @transform_1(%arg0: i32) -> (i32, i32) {
    %c0_i32 = arith.constant 0 : i32
    %c0_i32_0 = arith.constant 0 : i32
    return %arg0, %c0_i32 : i32, i32
  }
  func.func @transform_2(%arg0: i32) -> (i32, i32) {
    %c0_i32 = arith.constant 0 : i32
    %c0_i32_0 = arith.constant 0 : i32
    return %arg0, %c0_i32 : i32, i32
  }
}

</mosaic_0001>

<bundles_post_ra>
// kernel: tpu_custom_call.1
= control target key start
LH: loop header
LB: loop body
LE: loop exit
PB: predicated region body
PF: predicated region fallthrough
CT: control target
= control target key end

     0   :  { %7 = vsyncpa [#allocation3], 0  ;;  %s138_s0 = inlined_call_operand.hbm [shape: f32[8,256], index: 0, kind: input, shape index: {}]   ;;  %s139_s1 = inlined_call_operand.vmem [shape: f32[8,1], index: 1, kind: input, shape index: {}]   ;;  %s140_s2 = inlined_call_operand.hbm [shape: f32[8,256], index: 2, kind: output, shape index: {}]  }
   0x1   :  { %8 = vsyncpa [#allocation4], 0  ;;  %s14_s11 = sshll.u32 %s138_s0, 4  ;;  %s111_s12 = smov [#allocation2]   ;;  %s15_s11 = int_to_ptr.hbm [resolvable:$true] %s14_s11 }
   0x2   :  { %s16_s13 = sshll.u32 %s111_s12, 4  ;;  %s17_s13 = int_to_ptr.vmem [resolvable:$true] %s16_s13 }
   0x3   :  { %19 = dma.hbm_to_vmem [thread:$0]  %s15_s11, 256, %s17_s13, [#allocation3]  }
   0x4   :  { %107 = dma.done.wait [#allocation3], 256  }
   0x5   :  { %108 = vsyncadd [#allocation3], 4294967040  ;;  %v112_v0 = vmov 0   ;;  %v28_v1 = vld [vmem:[%s139_s1] sm:$0xff]  ;;  %v27_v3 = vld [vmem:[#allocation2 + $0x8] sm:$0xff]  ;;  %s113_s16 = smov [#allocation5]  }
   0x6   :  { %58 = vset.pattern.permute.xlu0 %v112_v0  ;;  %v26_v2 = vld [vmem:[#allocation2] sm:$0xff]  ;;  %s43_s17 = sshll.u32 %s113_s16, 4  ;;  %s45_s19 = sshll.u32 %s140_s2, 4  ;;  %s44_s17 = int_to_ptr.vmem [resolvable:$true] %s43_s17  ;;  %s46_s19 = int_to_ptr.hbm [resolvable:$true] %s45_s19 }
   0x7   :  { %31 = vperm.xlu0 %58, %v28_v1  }
  0x79   :  { %v32_v4 = vpop.permute.xlu0 %31 }
  0x7a   :  { %v34_v5 = vadd.f32 %v32_v4, %v26_v2  ;;  %v35_v6 = vadd.f32 %v32_v4, %v27_v3 }
  0x7c   :  { %36 = vst [vmem:[#allocation5] sm:$0xff] %v34_v5 }
  0x7d   :  { %37 = vst [vmem:[#allocation5 + $0x8] sm:$0xff] %v35_v6 }
  0x7e   :  { %48 = dma.vmem_to_hbm [thread:$0]  %s44_s17, 256, %s46_s19, [#allocation4]  }
  0x7f   :  { %109 = dma.done.wait [#allocation4], 256  }
  0x80   :  { %110 = vsyncadd [#allocation4], 4294967040 }
  0x81   :  { %53 = vsyncpa [#allocation3], 1 }
  0x82   :  { %54 = vsyncpa [#allocation4], 1 }

</bundles_post_ra>
